<compile_context>
chip_gen: v7x
topology: tpu7x:2x2x1
jax: 0.10.0
libtpu: 0.0.40
codegen_flags: <defaults>
</compile_context>

<pallas_src>
import jax
import jax.numpy as jnp
from jax import lax
from jax.experimental import pallas as pl
from jax.experimental.pallas import tpu as pltpu


def _round_up(x, m):
    return (x + m - 1) // m * m


def _lstm_edge_kernel(x_ref, fhi_ref, mask_ref, wih_ref, whh_ref,
                      out_ref, gx_ref, valid_ref):
    """One batch-block of the EdgeStateEncoder LSTM.

    x_ref    : [T, bB, D_in+1]  time-major joint history ++ ones (bias) col
    fhi_ref  : [bB, 1] int32    first_history_indices
    mask_ref : [bB, 1] f32      combined edge mask (ones if not dynamic edges)
    wih_ref  : [D_in+1, 4H]     input-hidden weights (+bias row, g-cols x2)
    whh_ref  : [H, 4H]          hidden-hidden weights (g-cols x2)
    out_ref  : [bB, H]
    gx_ref   : scratch VMEM [T, bB, 4H]  hoisted input projection
    valid_ref: scratch VMEM [T, bB, 1]   hoisted (t >= fhi) mask
    """
    T, bB, D_in1 = x_ref.shape
    H = whh_ref.shape[0]
    G = 4 * H
    wdt = wih_ref.dtype                    # bf16 when use_bf16_matmul else f32

    # ---- Hoisted input projection (bias folded in): one big MXU matmul
    #      outside the serial recurrence. ----
    x_flat = x_ref[...].reshape(T * bB, D_in1).astype(wdt)
    gx = jnp.dot(x_flat, wih_ref[...], preferred_element_type=jnp.float32)
    gx_ref[...] = gx.reshape(T, bB, G)

    # ---- Hoisted validity mask: re-emitting the compare/convert T times
    #      inside the unrolled recurrence would not be CSE'd. ----
    t_idx = lax.broadcasted_iota(jnp.int32, (T, bB, 1), 0)
    valid_ref[...] = (t_idx >= fhi_ref[...][None, :, :]).astype(jnp.float32)

    whh = whh_ref[...]                     # read once, loop constant

    # Lane mask selecting the 'g' gate.  The g-gate weight columns were
    # pre-scaled by 2 in the wrapper, so a single tanh(0.5*gates) pass gives
    # both tanh (g) and sigmoid (i/f/o via 0.5*t + 0.5).
    col = lax.broadcasted_iota(jnp.int32, (1, G), 1)
    g_sel = jnp.logical_and(col >= 2 * H, col < 3 * H)

    def step(t, carry):
        h, c = carry
        gates = gx_ref[t] + jnp.dot(h.astype(wdt), whh,
                                    preferred_element_type=jnp.float32)
        t_act = jnp.tanh(0.5 * gates)              # single EUP pass per step
        act = jnp.where(g_sel, t_act, 0.5 * t_act + 0.5)   # [bB, 4H]
        i_g = act[:, 0 * H:1 * H]
        f_g = act[:, 1 * H:2 * H]
        g_g = act[:, 2 * H:3 * H]
        o_g = act[:, 3 * H:4 * H]
        c_new = f_g * c + i_g * g_g
        h_new = o_g * jnp.tanh(c_new)
        # run_lstm_on_variable_length_seqs: keep zero state before fhi[b] so
        # the sub-sequence starting at fhi[b] begins from (h, c) = (0, 0).
        valid = valid_ref[t]                       # [bB, 1]
        return h_new * valid, c_new * valid

    h0 = jnp.zeros((bB, H), jnp.float32)
    c0 = jnp.zeros((bB, H), jnp.float32)
    # T is small & static -> full unroll gives the LLO scheduler cross-step
    # visibility (recurrent matmul / EUP / VPU co-issue across iterations).
    h_final, _ = lax.fori_loop(0, T, step, (h0, c0), unroll=True)

    # Dropout is identity at inference; dynamic-edge mask (all-ones when
    # use_dynamic_edges=False) applied here.
    out_ref[...] = (h_final * mask_ref[...]).astype(out_ref.dtype)


def edge_state_encoder_forward(
    node_history_st,        # [B, T, D_node] f32
    neighbors_pad,          # [B, N_max, T, D_nbr] f32 (zero-padded ragged)
    edge_values_pad,        # [B, N_max] f32 (zero-padded)
    first_history_indices,  # [B] int
    params,                 # dict of LSTM params (see init_params)
    use_dynamic_edges=True,
    block_b=512,
    use_bf16_matmul=False,  # bf16 MXU operands (f32 acc); ~1e-3 off f32 parity
):
    B, T, D_node = node_history_st.shape
    H = params["W_hh"].shape[0]
    G = 4 * H

    # ---- combine() [sum aggregation] done in the wrapper (cheap reductions;
    #      keeps the lane-padded neighbor tensor out of VMEM). ----
    nbr_sum = jnp.sum(neighbors_pad, axis=1)                     # [B, T, D_nbr]
    ones_col = jnp.ones((B, T, 1), jnp.float32)                  # bias column
    x = jnp.concatenate([nbr_sum, node_history_st, ones_col], axis=-1)
    if use_dynamic_edges:
        mask = jnp.minimum(jnp.sum(edge_values_pad, axis=1, keepdims=True), 1.0)
    else:
        mask = jnp.ones((B, 1), jnp.float32)

    # ---- Param prep: fold bias into W_ih as an extra row, pre-scale the
    #      g-gate columns by 2 so the kernel needs only one tanh per step. ----
    W_ih = jnp.concatenate(
        [params["W_ih_nbr"], params["W_ih_node"], params["bias"]], axis=0)
    W_hh = params["W_hh"]
    col = jnp.arange(G)
    g_scale = jnp.where((col >= 2 * H) & (col < 3 * H), 2.0, 1.0)[None, :]
    W_ih = (W_ih * g_scale).astype(jnp.float32)
    W_hh = (W_hh * g_scale).astype(jnp.float32)
    if use_bf16_matmul:
        W_ih = W_ih.astype(jnp.bfloat16)
        W_hh = W_hh.astype(jnp.bfloat16)
    D_in1 = W_ih.shape[0]

    # ---- Batch blocking: sublane-aligned block; keep >=2 grid blocks when
    #      the batch allows so the "parallel" axis shards across both
    #      TensorCores on v7x (megacore). ----
    B8 = _round_up(B, 8)
    bB = min(block_b, B8)
    if bB == B8 and B8 >= 16:
        bB = _round_up(max(B8 // 2, 8), 8)
    Bp = _round_up(B8, bB)
    pad = Bp - B
    x_p = jnp.pad(x, ((0, pad), (0, 0), (0, 0)))
    fhi_p = jnp.pad(first_history_indices.astype(jnp.int32).reshape(B, 1),
                    ((0, pad), (0, 0)))
    mask_p = jnp.pad(mask.astype(jnp.float32), ((0, pad), (0, 0)))
    x_tm = jnp.transpose(x_p, (1, 0, 2))                         # [T, Bp, D_in1]

    const = lambda i: (0, 0)
    out = pl.pallas_call(
        _lstm_edge_kernel,
        out_shape=jax.ShapeDtypeStruct((Bp, H), jnp.float32),
        grid_spec=pltpu.PrefetchScalarGridSpec(
            num_scalar_prefetch=0,
            grid=(Bp // bB,),
            in_specs=[
                pl.BlockSpec((T, bB, D_in1), lambda i: (0, i, 0)),  # x (time-major)
                pl.BlockSpec((bB, 1), lambda i: (i, 0)),            # fhi
                pl.BlockSpec((bB, 1), lambda i: (i, 0)),            # edge mask
                pl.BlockSpec((D_in1, G), const),                    # W_ih (+bias, pinned)
                pl.BlockSpec((H, G), const),                        # W_hh (pinned)
            ],
            out_specs=pl.BlockSpec((bB, H), lambda i: (i, 0)),
            scratch_shapes=[
                pltpu.VMEM((T, bB, G), jnp.float32),   # hoisted projection
                pltpu.VMEM((T, bB, 1), jnp.float32),   # hoisted validity mask
            ],
        ),
        compiler_params=pltpu.CompilerParams(
            dimension_semantics=("parallel",),
        ),
    )(x_tm, fhi_p, mask_p, W_ih, W_hh)
    return out[:B]


def init_params(key, d_nbr, d_node, hidden):
    """Deterministic PyTorch-style LSTM init: U(-1/sqrt(H), 1/sqrt(H))."""
    k = 1.0 / jnp.sqrt(hidden)
    ks = jax.random.split(key, 4)
    d_in = d_nbr + d_node
    w_ih = jax.random.uniform(ks[0], (d_in, 4 * hidden), jnp.float32, -k, k)
    w_hh = jax.random.uniform(ks[1], (hidden, 4 * hidden), jnp.float32, -k, k)
    b_ih = jax.random.uniform(ks[2], (4 * hidden,), jnp.float32, -k, k)
    b_hh = jax.random.uniform(ks[3], (4 * hidden,), jnp.float32, -k, k)
    return {
        "W_ih_nbr": w_ih[:d_nbr],            # combined_neighbors come first
        "W_ih_node": w_ih[d_nbr:],           # node_history_st second
        "W_hh": w_hh,
        "bias": (b_ih + b_hh).reshape(1, 4 * hidden),
    }


def reference_forward(node_history_st, neighbors_pad, edge_values_pad,
                      first_history_indices, params, use_dynamic_edges=True):
    """Pure-JAX reference for validation (mirrors the PyTorch module)."""
    B, T, _ = node_history_st.shape
    H = params["W_hh"].shape[0]
    nbr_sum = jnp.sum(neighbors_pad, axis=1)
    x = jnp.concatenate([nbr_sum, node_history_st], axis=-1)      # [B, T, D_in]
    W_ih = jnp.concatenate([params["W_ih_nbr"], params["W_ih_node"]], axis=0)
    W_hh, bias = params["W_hh"], params["bias"]
    fhi = first_history_indices.astype(jnp.int32).reshape(B, 1)

    def step(carry, inp):
        h, c = carry
        xt, t = inp
        gates = xt @ W_ih + h @ W_hh + bias
        i_g = jax.nn.sigmoid(gates[:, 0 * H:1 * H])
        f_g = jax.nn.sigmoid(gates[:, 1 * H:2 * H])
        g_g = jnp.tanh(gates[:, 2 * H:3 * H])
        o_g = jax.nn.sigmoid(gates[:, 3 * H:4 * H])
        c_new = f_g * c + i_g * g_g
        h_new = o_g * jnp.tanh(c_new)
        valid = (t >= fhi).astype(jnp.float32)
        return (h_new * valid, c_new * valid), None

    init = (jnp.zeros((B, H), jnp.float32), jnp.zeros((B, H), jnp.float32))
    (h, _), _ = lax.scan(step, init, (jnp.swapaxes(x, 0, 1), jnp.arange(T)))
    out = h
    if use_dynamic_edges:
        out = out * jnp.minimum(
            jnp.sum(edge_values_pad, axis=1, keepdims=True), 1.0)
    return out


if __name__ == "__main__":
    # Small shapes: B=4, T=8, neighbor state dim 6, node state dim 6,
    # LSTM hidden (output_dim) 32, up to 3 neighbors per batch element.
    B, T, D_NBR, D_NODE, H, N_MAX = 4, 8, 6, 6, 32, 3

    key = jax.random.PRNGKey(0)
    k_node, k_nbr, k_edge, k_param = jax.random.split(key, 4)

    node_history_st = jax.random.normal(k_node, (B, T, D_NODE), jnp.float32)

    # Ragged neighbor lists emulated by zero padding (0 neighbors -> all-zero
    # row, matching the module's explicit zeros tensor for empty lists).
    neighbor_counts = jnp.array([2, 0, 3, 1], jnp.int32)
    nbr_raw = jax.random.normal(k_nbr, (B, N_MAX, T, D_NBR), jnp.float32)
    nbr_mask = (jnp.arange(N_MAX)[None, :] < neighbor_counts[:, None]).astype(
        jnp.float32)
    neighbors_pad = nbr_raw * nbr_mask[:, :, None, None]

    edge_raw = jax.random.uniform(k_edge, (B, N_MAX), jnp.float32, 0.0, 1.0)
    edge_values_pad = edge_raw * nbr_mask

    first_history_indices = jnp.array([0, 3, 1, 5], jnp.int32)

    params = init_params(k_param, D_NBR, D_NODE, H)

    out = edge_state_encoder_forward(
        node_history_st, neighbors_pad, edge_values_pad,
        first_history_indices, params, use_dynamic_edges=True)
    out = jax.block_until_ready(out)

    ref = reference_forward(
        node_history_st, neighbors_pad, edge_values_pad,
        first_history_indices, params, use_dynamic_edges=True)
    ref = jax.block_until_ready(ref)

    assert out.shape == (B, H), out.shape
    assert jnp.allclose(out, ref, rtol=1e-5, atol=1e-5), (
        "mismatch vs reference: max abs err "
        f"{float(jnp.max(jnp.abs(out - ref)))}")

    print("KERNEL_OK")
</pallas_src>

<mosaic_0001>
module attributes {stable_mosaic.version = 11 : i64} {
  func.func @_lstm_edge_kernel(%arg0: i32, %arg1: memref<8x8x13xf32, #tpu.memory_space<vmem>>, %arg2: memref<8x1xi32, #tpu.memory_space<vmem>>, %arg3: memref<8x1xf32, #tpu.memory_space<vmem>>, %arg4: memref<13x128xf32, #tpu.memory_space<vmem>>, %arg5: memref<32x128xf32, #tpu.memory_space<vmem>>, %arg6: memref<8x32xf32, #tpu.memory_space<vmem>>, %arg7: memref<8x8x128xf32, #tpu.memory_space<vmem>>, %arg8: memref<8x8x1xf32, #tpu.memory_space<vmem>>) attributes {dimension_semantics = [#tpu.dimension_semantics<parallel>], iteration_bounds = array<i64: 1>, scalar_prefetch = 0 : i64, scratch_operands = 2 : i64, tpu.core_type = #tpu.core_type<tc>, window_params = [{transform_indices = @transform_0, window_bounds = array<i64: 8, 8, 13>}, {transform_indices = @transform_1, window_bounds = array<i64: 8, 1>}, {transform_indices = @transform_2, window_bounds = array<i64: 8, 1>}, {pipeline_mode = #tpu.pipeline_mode<synchronous>, transform_indices = @transform_3, window_bounds = array<i64: 13, 128>}, {pipeline_mode = #tpu.pipeline_mode<synchronous>, transform_indices = @transform_4, window_bounds = array<i64: 32, 128>}, {transform_indices = @transform_5, window_bounds = array<i64: 8, 32>}]} {
    %c0 = arith.constant 0 : index
    %c0_0 = arith.constant 0 : index
    %c0_1 = arith.constant 0 : index
    %0 = vector.load %arg1[%c0, %c0_0, %c0_1] : memref<8x8x13xf32, #tpu.memory_space<vmem>>, vector<8x8x13xf32>
    %1 = vector.shape_cast %0 : vector<8x8x13xf32> to vector<64x13xf32>
    %c0_2 = arith.constant 0 : index
    %c0_3 = arith.constant 0 : index
    %2 = vector.load %arg4[%c0_2, %c0_3] : memref<13x128xf32, #tpu.memory_space<vmem>>, vector<13x128xf32>
    %cst = arith.constant dense<0.000000e+00> : vector<64x128xf32>
    %3 = tpu.matmul %1, %2, %cst {dimension_numbers = #tpu.dot_dimension_numbers<[1], [0], [0], [1], [0, 0, 1, 1], [], []>} : vector<64x13xf32>, vector<13x128xf32>, vector<64x128xf32> -> vector<64x128xf32>
    %4 = vector.shape_cast %3 : vector<64x128xf32> to vector<8x8x128xf32>
    %c0_4 = arith.constant 0 : index
    %c0_5 = arith.constant 0 : index
    %c0_6 = arith.constant 0 : index
    %5 = vector.load %arg7[%c0_4, %c0_5, %c0_6] : memref<8x8x128xf32, #tpu.memory_space<vmem>>, vector<8x8x128xf32>
    tpu.vector_store %arg7[%c0_4, %c0_5, %c0_6], %4 {strides = array<i32>} : memref<8x8x128xf32, #tpu.memory_space<vmem>>, vector<8x8x128xf32>,
    %6 = tpu.iota {dimensions = array<i32: 0>} : vector<8x8x1xi32>
    %c0_7 = arith.constant 0 : index
    %c0_8 = arith.constant 0 : index
    %7 = vector.load %arg2[%c0_7, %c0_8] : memref<8x1xi32, #tpu.memory_space<vmem>>, vector<8x1xi32>
    %8 = vector.shape_cast %7 : vector<8x1xi32> to vector<1x8x1xi32>
    %9 = vector.broadcast %8 : vector<1x8x1xi32> to vector<8x8x1xi32>
    %10 = arith.cmpi sge, %6, %9 : vector<8x8x1xi32>
    %11 = arith.extui %10 : vector<8x8x1xi1> to vector<8x8x1xi32>
    %12 = arith.sitofp %11 : vector<8x8x1xi32> to vector<8x8x1xf32>
    %c0_9 = arith.constant 0 : index
    %c0_10 = arith.constant 0 : index
    %c0_11 = arith.constant 0 : index
    %13 = vector.load %arg8[%c0_9, %c0_10, %c0_11] : memref<8x8x1xf32, #tpu.memory_space<vmem>>, vector<8x8x1xf32>
    tpu.vector_store %arg8[%c0_9, %c0_10, %c0_11], %12 {strides = array<i32>} : memref<8x8x1xf32, #tpu.memory_space<vmem>>, vector<8x8x1xf32>,
    %c0_12 = arith.constant 0 : index
    %c0_13 = arith.constant 0 : index
    %14 = vector.load %arg5[%c0_12, %c0_13] : memref<32x128xf32, #tpu.memory_space<vmem>>, vector<32x128xf32>
    %15 = tpu.iota {dimensions = array<i32: 1>} : vector<1x128xi32>
    %c64_i32 = arith.constant 64 : i32
    %16 = vector.broadcast %c64_i32 : i32 to vector<1x128xi32>
    %17 = arith.cmpi sge, %15, %16 : vector<1x128xi32>
    %c96_i32 = arith.constant 96 : i32
    %18 = vector.broadcast %c96_i32 : i32 to vector<1x128xi32>
    %19 = arith.cmpi slt, %15, %18 : vector<1x128xi32>
    %20 = arith.andi %17, %19 : vector<1x128xi1>
    %cst_14 = arith.constant 0.000000e+00 : f32
    %21 = vector.broadcast %cst_14 : f32 to vector<8x32xf32>
    %cst_15 = arith.constant 0.000000e+00 : f32
    %22 = vector.broadcast %cst_15 : f32 to vector<8x32xf32>
    %c0_i32 = arith.constant 0 : i32
    %23 = arith.index_cast %c0_i32 : i32 to index
    %c0_16 = arith.constant 0 : index
    %c0_17 = arith.constant 0 : index
    %24 = vector.load %arg7[%23, %c0_16, %c0_17] : memref<8x8x128xf32, #tpu.memory_space<vmem>>, vector<1x8x128xf32>
    %25 = vector.shape_cast %24 : vector<1x8x128xf32> to vector<8x128xf32>
    %cst_18 = arith.constant dense<0.000000e+00> : vector<8x128xf32>
    %26 = tpu.matmul %21, %14, %cst_18 {dimension_numbers = #tpu.dot_dimension_numbers<[1], [0], [0], [1], [0, 0, 1, 1], [], []>} : vector<8x32xf32>, vector<32x128xf32>, vector<8x128xf32> -> vector<8x128xf32>
    %27 = arith.addf %25, %26 : vector<8x128xf32>
    %cst_19 = arith.constant 5.000000e-01 : f32
    %28 = vector.broadcast %cst_19 : f32 to vector<8x128xf32>
    %29 = arith.mulf %28, %27 : vector<8x128xf32>
    %30 = math.tanh %29 : vector<8x128xf32>
    %cst_20 = arith.constant 5.000000e-01 : f32
    %31 = vector.broadcast %cst_20 : f32 to vector<8x128xf32>
    %32 = arith.mulf %31, %30 : vector<8x128xf32>
    %cst_21 = arith.constant 5.000000e-01 : f32
    %33 = vector.broadcast %cst_21 : f32 to vector<8x128xf32>
    %34 = arith.addf %32, %33 : vector<8x128xf32>
    %35 = vector.shape_cast %20 : vector<1x128xi1> to vector<1x128xi1>
    %36 = vector.broadcast %35 : vector<1x128xi1> to vector<8x128xi1>
    %37 = arith.select %36, %30, %34 : vector<8x128xi1>, vector<8x128xf32>
    %38 = vector.extract_strided_slice %37 {offsets = [0, 0], sizes = [8, 32], strides = [1, 1]} : vector<8x128xf32> to vector<8x32xf32>
    %39 = vector.extract_strided_slice %37 {offsets = [0, 32], sizes = [8, 32], strides = [1, 1]} : vector<8x128xf32> to vector<8x32xf32>
    %40 = vector.extract_strided_slice %37 {offsets = [0, 64], sizes = [8, 32], strides = [1, 1]} : vector<8x128xf32> to vector<8x32xf32>
    %41 = vector.extract_strided_slice %37 {offsets = [0, 96], sizes = [8, 32], strides = [1, 1]} : vector<8x128xf32> to vector<8x32xf32>
    %42 = arith.mulf %39, %22 : vector<8x32xf32>
    %43 = arith.mulf %38, %40 : vector<8x32xf32>
    %44 = arith.addf %42, %43 : vector<8x32xf32>
    %45 = math.tanh %44 : vector<8x32xf32>
    %46 = arith.mulf %41, %45 : vector<8x32xf32>
    %47 = arith.index_cast %c0_i32 : i32 to index
    %c0_22 = arith.constant 0 : index
    %c0_23 = arith.constant 0 : index
    %48 = vector.load %arg8[%47, %c0_22, %c0_23] : memref<8x8x1xf32, #tpu.memory_space<vmem>>, vector<1x8x1xf32>
    %49 = vector.shape_cast %48 : vector<1x8x1xf32> to vector<8x1xf32>
    %50 = vector.broadcast %49 : vector<8x1xf32> to vector<8x32xf32>
    %51 = arith.mulf %46, %50 : vector<8x32xf32>
    %52 = vector.broadcast %49 : vector<8x1xf32> to vector<8x32xf32>
    %53 = arith.mulf %44, %52 : vector<8x32xf32>
    %c1_i32 = arith.constant 1 : i32
    %54 = arith.index_cast %c1_i32 : i32 to index
    %c0_24 = arith.constant 0 : index
    %c0_25 = arith.constant 0 : index
    %55 = vector.load %arg7[%54, %c0_24, %c0_25] : memref<8x8x128xf32, #tpu.memory_space<vmem>>, vector<1x8x128xf32>
    %56 = vector.shape_cast %55 : vector<1x8x128xf32> to vector<8x128xf32>
    %cst_26 = arith.constant dense<0.000000e+00> : vector<8x128xf32>
    %57 = tpu.matmul %51, %14, %cst_26 {dimension_numbers = #tpu.dot_dimension_numbers<[1], [0], [0], [1], [0, 0, 1, 1], [], []>} : vector<8x32xf32>, vector<32x128xf32>, vector<8x128xf32> -> vector<8x128xf32>
    %58 = arith.addf %56, %57 : vector<8x128xf32>
    %cst_27 = arith.constant 5.000000e-01 : f32
    %59 = vector.broadcast %cst_27 : f32 to vector<8x128xf32>
    %60 = arith.mulf %59, %58 : vector<8x128xf32>
    %61 = math.tanh %60 : vector<8x128xf32>
    %cst_28 = arith.constant 5.000000e-01 : f32
    %62 = vector.broadcast %cst_28 : f32 to vector<8x128xf32>
    %63 = arith.mulf %62, %61 : vector<8x128xf32>
    %cst_29 = arith.constant 5.000000e-01 : f32
    %64 = vector.broadcast %cst_29 : f32 to vector<8x128xf32>
    %65 = arith.addf %63, %64 : vector<8x128xf32>
    %66 = vector.shape_cast %20 : vector<1x128xi1> to vector<1x128xi1>
    %67 = vector.broadcast %66 : vector<1x128xi1> to vector<8x128xi1>
    %68 = arith.select %67, %61, %65 : vector<8x128xi1>, vector<8x128xf32>
    %69 = vector.extract_strided_slice %68 {offsets = [0, 0], sizes = [8, 32], strides = [1, 1]} : vector<8x128xf32> to vector<8x32xf32>
    %70 = vector.extract_strided_slice %68 {offsets = [0, 32], sizes = [8, 32], strides = [1, 1]} : vector<8x128xf32> to vector<8x32xf32>
    %71 = vector.extract_strided_slice %68 {offsets = [0, 64], sizes = [8, 32], strides = [1, 1]} : vector<8x128xf32> to vector<8x32xf32>
    %72 = vector.extract_strided_slice %68 {offsets = [0, 96], sizes = [8, 32], strides = [1, 1]} : vector<8x128xf32> to vector<8x32xf32>
    %73 = arith.mulf %70, %53 : vector<8x32xf32>
    %74 = arith.mulf %69, %71 : vector<8x32xf32>
    %75 = arith.addf %73, %74 : vector<8x32xf32>
    %76 = math.tanh %75 : vector<8x32xf32>
    %77 = arith.mulf %72, %76 : vector<8x32xf32>
    %78 = arith.index_cast %c1_i32 : i32 to index
    %c0_30 = arith.constant 0 : index
    %c0_31 = arith.constant 0 : index
    %79 = vector.load %arg8[%78, %c0_30, %c0_31] : memref<8x8x1xf32, #tpu.memory_space<vmem>>, vector<1x8x1xf32>
    %80 = vector.shape_cast %79 : vector<1x8x1xf32> to vector<8x1xf32>
    %81 = vector.broadcast %80 : vector<8x1xf32> to vector<8x32xf32>
    %82 = arith.mulf %77, %81 : vector<8x32xf32>
    %83 = vector.broadcast %80 : vector<8x1xf32> to vector<8x32xf32>
    %84 = arith.mulf %75, %83 : vector<8x32xf32>
    %c2_i32 = arith.constant 2 : i32
    %85 = arith.index_cast %c2_i32 : i32 to index
    %c0_32 = arith.constant 0 : index
    %c0_33 = arith.constant 0 : index
    %86 = vector.load %arg7[%85, %c0_32, %c0_33] : memref<8x8x128xf32, #tpu.memory_space<vmem>>, vector<1x8x128xf32>
    %87 = vector.shape_cast %86 : vector<1x8x128xf32> to vector<8x128xf32>
    %cst_34 = arith.constant dense<0.000000e+00> : vector<8x128xf32>
    %88 = tpu.matmul %82, %14, %cst_34 {dimension_numbers = #tpu.dot_dimension_numbers<[1], [0], [0], [1], [0, 0, 1, 1], [], []>} : vector<8x32xf32>, vector<32x128xf32>, vector<8x128xf32> -> vector<8x128xf32>
    %89 = arith.addf %87, %88 : vector<8x128xf32>
    %cst_35 = arith.constant 5.000000e-01 : f32
    %90 = vector.broadcast %cst_35 : f32 to vector<8x128xf32>
    %91 = arith.mulf %90, %89 : vector<8x128xf32>
    %92 = math.tanh %91 : vector<8x128xf32>
    %cst_36 = arith.constant 5.000000e-01 : f32
    %93 = vector.broadcast %cst_36 : f32 to vector<8x128xf32>
    %94 = arith.mulf %93, %92 : vector<8x128xf32>
    %cst_37 = arith.constant 5.000000e-01 : f32
    %95 = vector.broadcast %cst_37 : f32 to vector<8x128xf32>
    %96 = arith.addf %94, %95 : vector<8x128xf32>
    %97 = vector.shape_cast %20 : vector<1x128xi1> to vector<1x128xi1>
    %98 = vector.broadcast %97 : vector<1x128xi1> to vector<8x128xi1>
    %99 = arith.select %98, %92, %96 : vector<8x128xi1>, vector<8x128xf32>
    %100 = vector.extract_strided_slice %99 {offsets = [0, 0], sizes = [8, 32], strides = [1, 1]} : vector<8x128xf32> to vector<8x32xf32>
    %101 = vector.extract_strided_slice %99 {offsets = [0, 32], sizes = [8, 32], strides = [1, 1]} : vector<8x128xf32> to vector<8x32xf32>
    %102 = vector.extract_strided_slice %99 {offsets = [0, 64], sizes = [8, 32], strides = [1, 1]} : vector<8x128xf32> to vector<8x32xf32>
    %103 = vector.extract_strided_slice %99 {offsets = [0, 96], sizes = [8, 32], strides = [1, 1]} : vector<8x128xf32> to vector<8x32xf32>
    %104 = arith.mulf %101, %84 : vector<8x32xf32>
    %105 = arith.mulf %100, %102 : vector<8x32xf32>
    %106 = arith.addf %104, %105 : vector<8x32xf32>
    %107 = math.tanh %106 : vector<8x32xf32>
    %108 = arith.mulf %103, %107 : vector<8x32xf32>
    %109 = arith.index_cast %c2_i32 : i32 to index
    %c0_38 = arith.constant 0 : index
    %c0_39 = arith.constant 0 : index
    %110 = vector.load %arg8[%109, %c0_38, %c0_39] : memref<8x8x1xf32, #tpu.memory_space<vmem>>, vector<1x8x1xf32>
    %111 = vector.shape_cast %110 : vector<1x8x1xf32> to vector<8x1xf32>
    %112 = vector.broadcast %111 : vector<8x1xf32> to vector<8x32xf32>
    %113 = arith.mulf %108, %112 : vector<8x32xf32>
    %114 = vector.broadcast %111 : vector<8x1xf32> to vector<8x32xf32>
    %115 = arith.mulf %106, %114 : vector<8x32xf32>
    %c3_i32 = arith.constant 3 : i32
    %116 = arith.index_cast %c3_i32 : i32 to index
    %c0_40 = arith.constant 0 : index
    %c0_41 = arith.constant 0 : index
    %117 = vector.load %arg7[%116, %c0_40, %c0_41] : memref<8x8x128xf32, #tpu.memory_space<vmem>>, vector<1x8x128xf32>
    %118 = vector.shape_cast %117 : vector<1x8x128xf32> to vector<8x128xf32>
    %cst_42 = arith.constant dense<0.000000e+00> : vector<8x128xf32>
    %119 = tpu.matmul %113, %14, %cst_42 {dimension_numbers = #tpu.dot_dimension_numbers<[1], [0], [0], [1], [0, 0, 1, 1], [], []>} : vector<8x32xf32>, vector<32x128xf32>, vector<8x128xf32> -> vector<8x128xf32>
    %120 = arith.addf %118, %119 : vector<8x128xf32>
    %cst_43 = arith.constant 5.000000e-01 : f32
    %121 = vector.broadcast %cst_43 : f32 to vector<8x128xf32>
    %122 = arith.mulf %121, %120 : vector<8x128xf32>
    %123 = math.tanh %122 : vector<8x128xf32>
    %cst_44 = arith.constant 5.000000e-01 : f32
    %124 = vector.broadcast %cst_44 : f32 to vector<8x128xf32>
    %125 = arith.mulf %124, %123 : vector<8x128xf32>
    %cst_45 = arith.constant 5.000000e-01 : f32
    %126 = vector.broadcast %cst_45 : f32 to vector<8x128xf32>
    %127 = arith.addf %125, %126 : vector<8x128xf32>
    %128 = vector.shape_cast %20 : vector<1x128xi1> to vector<1x128xi1>
    %129 = vector.broadcast %128 : vector<1x128xi1> to vector<8x128xi1>
    %130 = arith.select %129, %123, %127 : vector<8x128xi1>, vector<8x128xf32>
    %131 = vector.extract_strided_slice %130 {offsets = [0, 0], sizes = [8, 32], strides = [1, 1]} : vector<8x128xf32> to vector<8x32xf32>
    %132 = vector.extract_strided_slice %130 {offsets = [0, 32], sizes = [8, 32], strides = [1, 1]} : vector<8x128xf32> to vector<8x32xf32>
    %133 = vector.extract_strided_slice %130 {offsets = [0, 64], sizes = [8, 32], strides = [1, 1]} : vector<8x128xf32> to vector<8x32xf32>
    %134 = vector.extract_strided_slice %130 {offsets = [0, 96], sizes = [8, 32], strides = [1, 1]} : vector<8x128xf32> to vector<8x32xf32>
    %135 = arith.mulf %132, %115 : vector<8x32xf32>
    %136 = arith.mulf %131, %133 : vector<8x32xf32>
    %137 = arith.addf %135, %136 : vector<8x32xf32>
    %138 = math.tanh %137 : vector<8x32xf32>
    %139 = arith.mulf %134, %138 : vector<8x32xf32>
    %140 = arith.index_cast %c3_i32 : i32 to index
    %c0_46 = arith.constant 0 : index
    %c0_47 = arith.constant 0 : index
    %141 = vector.load %arg8[%140, %c0_46, %c0_47] : memref<8x8x1xf32, #tpu.memory_space<vmem>>, vector<1x8x1xf32>
    %142 = vector.shape_cast %141 : vector<1x8x1xf32> to vector<8x1xf32>
    %143 = vector.broadcast %142 : vector<8x1xf32> to vector<8x32xf32>
    %144 = arith.mulf %139, %143 : vector<8x32xf32>
    %145 = vector.broadcast %142 : vector<8x1xf32> to vector<8x32xf32>
    %146 = arith.mulf %137, %145 : vector<8x32xf32>
    %c4_i32 = arith.constant 4 : i32
    %147 = arith.index_cast %c4_i32 : i32 to index
    %c0_48 = arith.constant 0 : index
    %c0_49 = arith.constant 0 : index
    %148 = vector.load %arg7[%147, %c0_48, %c0_49] : memref<8x8x128xf32, #tpu.memory_space<vmem>>, vector<1x8x128xf32>
    %149 = vector.shape_cast %148 : vector<1x8x128xf32> to vector<8x128xf32>
    %cst_50 = arith.constant dense<0.000000e+00> : vector<8x128xf32>
    %150 = tpu.matmul %144, %14, %cst_50 {dimension_numbers = #tpu.dot_dimension_numbers<[1], [0], [0], [1], [0, 0, 1, 1], [], []>} : vector<8x32xf32>, vector<32x128xf32>, vector<8x128xf32> -> vector<8x128xf32>
    %151 = arith.addf %149, %150 : vector<8x128xf32>
    %cst_51 = arith.constant 5.000000e-01 : f32
    %152 = vector.broadcast %cst_51 : f32 to vector<8x128xf32>
    %153 = arith.mulf %152, %151 : vector<8x128xf32>
    %154 = math.tanh %153 : vector<8x128xf32>
    %cst_52 = arith.constant 5.000000e-01 : f32
    %155 = vector.broadcast %cst_52 : f32 to vector<8x128xf32>
    %156 = arith.mulf %155, %154 : vector<8x128xf32>
    %cst_53 = arith.constant 5.000000e-01 : f32
    %157 = vector.broadcast %cst_53 : f32 to vector<8x128xf32>
    %158 = arith.addf %156, %157 : vector<8x128xf32>
    %159 = vector.shape_cast %20 : vector<1x128xi1> to vector<1x128xi1>
    %160 = vector.broadcast %159 : vector<1x128xi1> to vector<8x128xi1>
    %161 = arith.select %160, %154, %158 : vector<8x128xi1>, vector<8x128xf32>
    %162 = vector.extract_strided_slice %161 {offsets = [0, 0], sizes = [8, 32], strides = [1, 1]} : vector<8x128xf32> to vector<8x32xf32>
    %163 = vector.extract_strided_slice %161 {offsets = [0, 32], sizes = [8, 32], strides = [1, 1]} : vector<8x128xf32> to vector<8x32xf32>
    %164 = vector.extract_strided_slice %161 {offsets = [0, 64], sizes = [8, 32], strides = [1, 1]} : vector<8x128xf32> to vector<8x32xf32>
    %165 = vector.extract_strided_slice %161 {offsets = [0, 96], sizes = [8, 32], strides = [1, 1]} : vector<8x128xf32> to vector<8x32xf32>
    %166 = arith.mulf %163, %146 : vector<8x32xf32>
    %167 = arith.mulf %162, %164 : vector<8x32xf32>
    %168 = arith.addf %166, %167 : vector<8x32xf32>
    %169 = math.tanh %168 : vector<8x32xf32>
    %170 = arith.mulf %165, %169 : vector<8x32xf32>
    %171 = arith.index_cast %c4_i32 : i32 to index
    %c0_54 = arith.constant 0 : index
    %c0_55 = arith.constant 0 : index
    %172 = vector.load %arg8[%171, %c0_54, %c0_55] : memref<8x8x1xf32, #tpu.memory_space<vmem>>, vector<1x8x1xf32>
    %173 = vector.shape_cast %172 : vector<1x8x1xf32> to vector<8x1xf32>
    %174 = vector.broadcast %173 : vector<8x1xf32> to vector<8x32xf32>
    %175 = arith.mulf %170, %174 : vector<8x32xf32>
    %176 = vector.broadcast %173 : vector<8x1xf32> to vector<8x32xf32>
    %177 = arith.mulf %168, %176 : vector<8x32xf32>
    %c5_i32 = arith.constant 5 : i32
    %178 = arith.index_cast %c5_i32 : i32 to index
    %c0_56 = arith.constant 0 : index
    %c0_57 = arith.constant 0 : index
    %179 = vector.load %arg7[%178, %c0_56, %c0_57] : memref<8x8x128xf32, #tpu.memory_space<vmem>>, vector<1x8x128xf32>
    %180 = vector.shape_cast %179 : vector<1x8x128xf32> to vector<8x128xf32>
    %cst_58 = arith.constant dense<0.000000e+00> : vector<8x128xf32>
    %181 = tpu.matmul %175, %14, %cst_58 {dimension_numbers = #tpu.dot_dimension_numbers<[1], [0], [0], [1], [0, 0, 1, 1], [], []>} : vector<8x32xf32>, vector<32x128xf32>, vector<8x128xf32> -> vector<8x128xf32>
    %182 = arith.addf %180, %181 : vector<8x128xf32>
    %cst_59 = arith.constant 5.000000e-01 : f32
    %183 = vector.broadcast %cst_59 : f32 to vector<8x128xf32>
    %184 = arith.mulf %183, %182 : vector<8x128xf32>
    %185 = math.tanh %184 : vector<8x128xf32>
    %cst_60 = arith.constant 5.000000e-01 : f32
    %186 = vector.broadcast %cst_60 : f32 to vector<8x128xf32>
    %187 = arith.mulf %186, %185 : vector<8x128xf32>
    %cst_61 = arith.constant 5.000000e-01 : f32
    %188 = vector.broadcast %cst_61 : f32 to vector<8x128xf32>
    %189 = arith.addf %187, %188 : vector<8x128xf32>
    %190 = vector.shape_cast %20 : vector<1x128xi1> to vector<1x128xi1>
    %191 = vector.broadcast %190 : vector<1x128xi1> to vector<8x128xi1>
    %192 = arith.select %191, %185, %189 : vector<8x128xi1>, vector<8x128xf32>
    %193 = vector.extract_strided_slice %192 {offsets = [0, 0], sizes = [8, 32], strides = [1, 1]} : vector<8x128xf32> to vector<8x32xf32>
    %194 = vector.extract_strided_slice %192 {offsets = [0, 32], sizes = [8, 32], strides = [1, 1]} : vector<8x128xf32> to vector<8x32xf32>
    %195 = vector.extract_strided_slice %192 {offsets = [0, 64], sizes = [8, 32], strides = [1, 1]} : vector<8x128xf32> to vector<8x32xf32>
    %196 = vector.extract_strided_slice %192 {offsets = [0, 96], sizes = [8, 32], strides = [1, 1]} : vector<8x128xf32> to vector<8x32xf32>
    %197 = arith.mulf %194, %177 : vector<8x32xf32>
    %198 = arith.mulf %193, %195 : vector<8x32xf32>
    %199 = arith.addf %197, %198 : vector<8x32xf32>
    %200 = math.tanh %199 : vector<8x32xf32>
    %201 = arith.mulf %196, %200 : vector<8x32xf32>
    %202 = arith.index_cast %c5_i32 : i32 to index
    %c0_62 = arith.constant 0 : index
    %c0_63 = arith.constant 0 : index
    %203 = vector.load %arg8[%202, %c0_62, %c0_63] : memref<8x8x1xf32, #tpu.memory_space<vmem>>, vector<1x8x1xf32>
    %204 = vector.shape_cast %203 : vector<1x8x1xf32> to vector<8x1xf32>
    %205 = vector.broadcast %204 : vector<8x1xf32> to vector<8x32xf32>
    %206 = arith.mulf %201, %205 : vector<8x32xf32>
    %207 = vector.broadcast %204 : vector<8x1xf32> to vector<8x32xf32>
    %208 = arith.mulf %199, %207 : vector<8x32xf32>
    %c6_i32 = arith.constant 6 : i32
    %209 = arith.index_cast %c6_i32 : i32 to index
    %c0_64 = arith.constant 0 : index
    %c0_65 = arith.constant 0 : index
    %210 = vector.load %arg7[%209, %c0_64, %c0_65] : memref<8x8x128xf32, #tpu.memory_space<vmem>>, vector<1x8x128xf32>
    %211 = vector.shape_cast %210 : vector<1x8x128xf32> to vector<8x128xf32>
    %cst_66 = arith.constant dense<0.000000e+00> : vector<8x128xf32>
    %212 = tpu.matmul %206, %14, %cst_66 {dimension_numbers = #tpu.dot_dimension_numbers<[1], [0], [0], [1], [0, 0, 1, 1], [], []>} : vector<8x32xf32>, vector<32x128xf32>, vector<8x128xf32> -> vector<8x128xf32>
    %213 = arith.addf %211, %212 : vector<8x128xf32>
    %cst_67 = arith.constant 5.000000e-01 : f32
    %214 = vector.broadcast %cst_67 : f32 to vector<8x128xf32>
    %215 = arith.mulf %214, %213 : vector<8x128xf32>
    %216 = math.tanh %215 : vector<8x128xf32>
    %cst_68 = arith.constant 5.000000e-01 : f32
    %217 = vector.broadcast %cst_68 : f32 to vector<8x128xf32>
    %218 = arith.mulf %217, %216 : vector<8x128xf32>
    %cst_69 = arith.constant 5.000000e-01 : f32
    %219 = vector.broadcast %cst_69 : f32 to vector<8x128xf32>
    %220 = arith.addf %218, %219 : vector<8x128xf32>
    %221 = vector.shape_cast %20 : vector<1x128xi1> to vector<1x128xi1>
    %222 = vector.broadcast %221 : vector<1x128xi1> to vector<8x128xi1>
    %223 = arith.select %222, %216, %220 : vector<8x128xi1>, vector<8x128xf32>
    %224 = vector.extract_strided_slice %223 {offsets = [0, 0], sizes = [8, 32], strides = [1, 1]} : vector<8x128xf32> to vector<8x32xf32>
    %225 = vector.extract_strided_slice %223 {offsets = [0, 32], sizes = [8, 32], strides = [1, 1]} : vector<8x128xf32> to vector<8x32xf32>
    %226 = vector.extract_strided_slice %223 {offsets = [0, 64], sizes = [8, 32], strides = [1, 1]} : vector<8x128xf32> to vector<8x32xf32>
    %227 = vector.extract_strided_slice %223 {offsets = [0, 96], sizes = [8, 32], strides = [1, 1]} : vector<8x128xf32> to vector<8x32xf32>
    %228 = arith.mulf %225, %208 : vector<8x32xf32>
    %229 = arith.mulf %224, %226 : vector<8x32xf32>
    %230 = arith.addf %228, %229 : vector<8x32xf32>
    %231 = math.tanh %230 : vector<8x32xf32>
    %232 = arith.mulf %227, %231 : vector<8x32xf32>
    %233 = arith.index_cast %c6_i32 : i32 to index
    %c0_70 = arith.constant 0 : index
    %c0_71 = arith.constant 0 : index
    %234 = vector.load %arg8[%233, %c0_70, %c0_71] : memref<8x8x1xf32, #tpu.memory_space<vmem>>, vector<1x8x1xf32>
    %235 = vector.shape_cast %234 : vector<1x8x1xf32> to vector<8x1xf32>
    %236 = vector.broadcast %235 : vector<8x1xf32> to vector<8x32xf32>
    %237 = arith.mulf %232, %236 : vector<8x32xf32>
    %238 = vector.broadcast %235 : vector<8x1xf32> to vector<8x32xf32>
    %239 = arith.mulf %230, %238 : vector<8x32xf32>
    %c7_i32 = arith.constant 7 : i32
    %240 = arith.index_cast %c7_i32 : i32 to index
    %c0_72 = arith.constant 0 : index
    %c0_73 = arith.constant 0 : index
    %241 = vector.load %arg7[%240, %c0_72, %c0_73] : memref<8x8x128xf32, #tpu.memory_space<vmem>>, vector<1x8x128xf32>
    %242 = vector.shape_cast %241 : vector<1x8x128xf32> to vector<8x128xf32>
    %cst_74 = arith.constant dense<0.000000e+00> : vector<8x128xf32>
    %243 = tpu.matmul %237, %14, %cst_74 {dimension_numbers = #tpu.dot_dimension_numbers<[1], [0], [0], [1], [0, 0, 1, 1], [], []>} : vector<8x32xf32>, vector<32x128xf32>, vector<8x128xf32> -> vector<8x128xf32>
    %244 = arith.addf %242, %243 : vector<8x128xf32>
    %cst_75 = arith.constant 5.000000e-01 : f32
    %245 = vector.broadcast %cst_75 : f32 to vector<8x128xf32>
    %246 = arith.mulf %245, %244 : vector<8x128xf32>
    %247 = math.tanh %246 : vector<8x128xf32>
    %cst_76 = arith.constant 5.000000e-01 : f32
    %248 = vector.broadcast %cst_76 : f32 to vector<8x128xf32>
    %249 = arith.mulf %248, %247 : vector<8x128xf32>
    %cst_77 = arith.constant 5.000000e-01 : f32
    %250 = vector.broadcast %cst_77 : f32 to vector<8x128xf32>
    %251 = arith.addf %249, %250 : vector<8x128xf32>
    %252 = vector.shape_cast %20 : vector<1x128xi1> to vector<1x128xi1>
    %253 = vector.broadcast %252 : vector<1x128xi1> to vector<8x128xi1>
    %254 = arith.select %253, %247, %251 : vector<8x128xi1>, vector<8x128xf32>
    %255 = vector.extract_strided_slice %254 {offsets = [0, 0], sizes = [8, 32], strides = [1, 1]} : vector<8x128xf32> to vector<8x32xf32>
    %256 = vector.extract_strided_slice %254 {offsets = [0, 32], sizes = [8, 32], strides = [1, 1]} : vector<8x128xf32> to vector<8x32xf32>
    %257 = vector.extract_strided_slice %254 {offsets = [0, 64], sizes = [8, 32], strides = [1, 1]} : vector<8x128xf32> to vector<8x32xf32>
    %258 = vector.extract_strided_slice %254 {offsets = [0, 96], sizes = [8, 32], strides = [1, 1]} : vector<8x128xf32> to vector<8x32xf32>
    %259 = arith.mulf %256, %239 : vector<8x32xf32>
    %260 = arith.mulf %255, %257 : vector<8x32xf32>
    %261 = arith.addf %259, %260 : vector<8x32xf32>
    %262 = math.tanh %261 : vector<8x32xf32>
    %263 = arith.mulf %258, %262 : vector<8x32xf32>
    %264 = arith.index_cast %c7_i32 : i32 to index
    %c0_78 = arith.constant 0 : index
    %c0_79 = arith.constant 0 : index
    %265 = vector.load %arg8[%264, %c0_78, %c0_79] : memref<8x8x1xf32, #tpu.memory_space<vmem>>, vector<1x8x1xf32>
    %266 = vector.shape_cast %265 : vector<1x8x1xf32> to vector<8x1xf32>
    %267 = vector.broadcast %266 : vector<8x1xf32> to vector<8x32xf32>
    %268 = arith.mulf %263, %267 : vector<8x32xf32>
    %269 = vector.broadcast %266 : vector<8x1xf32> to vector<8x32xf32>
    %270 = arith.mulf %261, %269 : vector<8x32xf32>
    %c8_i32 = arith.constant 8 : i32
    %c0_80 = arith.constant 0 : index
    %c0_81 = arith.constant 0 : index
    %271 = vector.load %arg3[%c0_80, %c0_81] : memref<8x1xf32, #tpu.memory_space<vmem>>, vector<8x1xf32>
    %272 = vector.broadcast %271 : vector<8x1xf32> to vector<8x32xf32>
    %273 = arith.mulf %268, %272 : vector<8x32xf32>
    %c0_82 = arith.constant 0 : index
    %c0_83 = arith.constant 0 : index
    %274 = vector.load %arg6[%c0_82, %c0_83] : memref<8x32xf32, #tpu.memory_space<vmem>>, vector<8x32xf32>
    tpu.vector_store %arg6[%c0_82, %c0_83], %273 {strides = array<i32>} : memref<8x32xf32, #tpu.memory_space<vmem>>, vector<8x32xf32>,
    return
  }
  func.func @transform_0(%arg0: i32) -> (i32, i32, i32) {
    %c0_i32 = arith.constant 0 : i32
    %c0_i32_0 = arith.constant 0 : i32
    %c0_i32_1 = arith.constant 0 : i32
    return %c0_i32, %arg0, %c0_i32_0 : i32, i32, i32
  }
  func.func @transform_1(%arg0: i32) -> (i32, i32) {
    %c0_i32 = arith.constant 0 : i32
    %c0_i32_0 = arith.constant 0 : i32
    return %arg0, %c0_i32 : i32, i32
  }
  func.func @transform_2(%arg0: i32) -> (i32, i32) {
    %c0_i32 = arith.constant 0 : i32
    %c0_i32_0 = arith.constant 0 : i32
    return %arg0, %c0_i32 : i32, i32
  }
  func.func @transform_3(%arg0: i32) -> (i32, i32) {
    %c0_i32 = arith.constant 0 : i32
    %c0_i32_0 = arith.constant 0 : i32
    %c0_i32_1 = arith.constant 0 : i32
    return %c0_i32, %c0_i32_0 : i32, i32
  }
  func.func @transform_4(%arg0: i32) -> (i32, i32) {
    %c0_i32 = arith.constant 0 : i32
    %c0_i32_0 = arith.constant 0 : i32
    %c0_i32_1 = arith.constant 0 : i32
    return %c0_i32, %c0_i32_0 : i32, i32
  }
  func.func @transform_5(%arg0: i32) -> (i32, i32) {
    %c0_i32 = arith.constant 0 : i32
    %c0_i32_0 = arith.constant 0 : i32
    return %arg0, %c0_i32 : i32, i32
  }
}

</mosaic_0001>

<bundles_post_ra>
// kernel: tpu_custom_call.1
= control target key start
LH: loop header
LB: loop body
LE: loop exit
PB: predicated region body
PF: predicated region fallthrough
CT: control target
= control target key end

     0   :  { %10 = vsyncpa [#allocation5], 0  ;;  %s1755_s0 = inlined_call_operand.hbm [shape: f32[8,8,13], index: 0, kind: input, shape index: {}]   ;;  %s1756_s1 = inlined_call_operand.vmem [shape: s32[8,1], index: 1, kind: input, shape index: {}]   ;;  %s1757_s2 = inlined_call_operand.vmem [shape: f32[8,1], index: 2, kind: input, shape index: {}]   ;;  %s1758_s3 = inlined_call_operand.hbm [shape: f32[13,128], index: 3, kind: input, shape index: {}]   ;;  %s1759_s4 = inlined_call_operand.vmem [shape: f32[32,128], index: 4, kind: input, shape index: {}]   ;;  %s1760_s5 = inlined_call_operand.hbm [shape: f32[8,32], index: 5, kind: output, shape index: {}]  }
   0x1   :  { %11 = vsyncpa [#allocation8], 0 }
   0x2   :  { %12 = vsyncpa [#allocation6], 0  ;;  %s1492_s18 = smov [#allocation4]   ;;  %s1420_s22 = scalar_lea.hbm %s1755_s0, 1024 }
   0x3   :  { %s18_s19 = sshll.u32 %s1492_s18, 4  ;;  %p1421_p0 = scmp.ne.s32.totalorder %s1755_s0, %s1420_s22  ;;  %s19_s19 = int_to_ptr.vmem [resolvable:$true] %s18_s19 }
   0x4   :  { %p1424_p1 = scmp.lt.u32.totalorder %s1420_s22, %s1755_s0 }
   0x6   :  { %p1426_p2 = pnand %p1424_p1, %p1421_p0 }
   0x8   :  { %1429 = shalt.err (!%p1426_p2)
}
   0x9   :  { %s1430_s27 = scalar_lea.vmem %s19_s19, 1024  ;;  %p1435_p4 = scmp.lt.s32.totalorder %s19_s19, %s19_s19 }
   0xa   :  { %p1431_p3 = scmp.ne.s32.totalorder %s19_s19, %s1430_s27  ;;  %p1436_p5 = scmp.lt.s32.totalorder %s1430_s27, %s1430_s27 }
   0xc   :  { %p1437_p6 = por %p1436_p5, %p1435_p4 }
   0xe   :  { %p1438_p7 = pnand %p1437_p6, %p1431_p3 }
  0x10   :  { %1441 = shalt.err (!%p1438_p7)
}
  0x11   :  { %s1493_s28 = smov 128   ;;  %s1494_s29 = smov 8  }
  0x12   :  { %24 = dma.hbm_to_vmem [thread:$0]  %s1755_s0, 1024, %s19_s19, [#allocation5], %s1493_s28, %s1493_s28, %s1494_s29  }
  0x13   :  { %s1495_s7 = smov [#allocation7]   ;;  %s1442_s11 = scalar_lea.hbm %s1758_s3, 256 }
  0x14   :  { %s34_s8 = sshll.u32 %s1495_s7, 4  ;;  %p1443_p8 = scmp.ne.s32.totalorder %s1758_s3, %s1442_s11  ;;  %s35_s8 = int_to_ptr.vmem [resolvable:$true] %s34_s8 }
  0x15   :  { %p1446_p9 = scmp.lt.u32.totalorder %s1442_s11, %s1758_s3 }
  0x17   :  { %p1448_p10 = pnand %p1446_p9, %p1443_p8 }
  0x19   :  { %1451 = shalt.err (!%p1448_p10)
}
  0x1a   :  { %s1452_s16 = scalar_lea.vmem %s35_s8, 256  ;;  %p1457_p12 = scmp.lt.s32.totalorder %s35_s8, %s35_s8 }
  0x1b   :  { %p1453_p11 = scmp.ne.s32.totalorder %s35_s8, %s1452_s16  ;;  %p1458_p13 = scmp.lt.s32.totalorder %s1452_s16, %s1452_s16 }
  0x1d   :  { %p1459_p0 = por %p1458_p13, %p1457_p12 }
  0x1f   :  { %p1460_p1 = pnand %p1459_p0, %p1453_p11 }
  0x21   :  { %1463 = shalt.err (!%p1460_p1)
}
  0x22   :  { %40 = dma.hbm_to_vmem [thread:$0]  %s1758_s3, 256, %s35_s8, [#allocation8], %s1493_s28, %s1493_s28, %s1494_s29  }
  0x23   :  { %1486 = dma.done.wait [#allocation5], 1024  }
  0x24   :  { %1487 = vsyncadd [#allocation5], 4294966272 }
  0x25   :  { %1488 = dma.done.wait [#allocation8], 256  }
  0x26   :  { %1489 = vsyncadd [#allocation8], 4294967040  ;;  %v1496_v0 = vmov 0.0|0.0   ;;  %vm1497_vm0 = vmmov 0   ;;  %v1498_v1 = vmov 0.0   ;;  %vm84_vm1 = vcmask 1044480  }
  0x27   :  { %1326 = vmatprep.subr.bf16.mxu1 %v1496_v0  ;;  %1240 = vmatprep.mubr.msk.f32.mxu1 %vm1497_vm0, %v1498_v1  ;;  %vm1499_vm2 = vmmov 1   ;;  %vm59_vm4 = vcmask 105472   ;;  %v235_v3 = vld [vmem:[%s1759_s4] sm:$0xff]  ;;  %v236_v4 = vld [vmem:[%s1759_s4 + $0x8] sm:$0xff]  ;;  %v237_v9 = vld [vmem:[%s1759_s4 + $0x10] sm:$0xff]  ;;  %vm226_vm5 = vcmask 7168   ;;  %v239_v24 = vlaneseq }
  0x28   :  { %vm1561_vm3 = vmpackc.low %vm84_vm1, %vm1499_vm2  ;;  %v57_v5 = vld [vmem:[#allocation7] sm:$0xff]  ;;  %v1571_v6 = vpack.c.bf16 %v236_v4, %v235_v3  ;;  %v58_v7 = vld [vmem:[#allocation7 + $0x8] sm:$0x1f]  ;;  %v1500_v15 = vmov 0   ;;  %s1502_s26 = smov 32   ;;  %vm245_vm10 = vcmask 261120  }
  0x29   :  { %v49_v8 = vld [vmem:[#allocation4] sm:$0xff]  ;;  %v1320_v10 = vpack.c.bf16 %v58_v7, %v57_v5  ;;  %v238_v11 = vld [vmem:[%s1759_s4 + $0x18] sm:$0xff]  ;;  %v50_v13 = vld [vmem:[#allocation4 + $0x8] sm:$0xff]  ;;  %1386 = vset.pattern.permute.xlu1 %v1500_v15  ;;  %1387 = vset.pattern.permute.xlu0 %v1500_v15  ;;  %v240_v25 = vand.u32 127, %v239_v24  ;;  %s1503_s29 = smov [#allocation9]  }
  0x2a   :  { %1220 = vmatprep.mubr.msk.f32.mxu0 %vm59_vm4, %v49_v8  ;;  %1328 = vmatpush3.bf16.msra.mxu1 %v1571_v6  ;;  %v1581_v12 = vpack.c.bf16 %v238_v11, %v237_v9  ;;  %v1606_v14 = vld [vmem:[%s1756_s1] sm:$0xff]  ;;  %s1501_s1 = smov 64   ;;  %v51_v58 = vld [vmem:[#allocation4 + $0x10] sm:$0xff]  ;;  %v52_v59 = vld [vmem:[#allocation4 + $0x18] sm:$0xff]  ;;  %s1132_s30 = sshll.u32 %s1503_s29, 4  ;;  %s1133_s30 = int_to_ptr.vmem [resolvable:$true] %s1132_s30 }
  0x2b   :  { %1322 = vmatprep.subr.msk.bf16.mxu0 %vm1561_vm3, %v1320_v10  ;;  %1329 = vmatprep.subr.bf16.mxu1 %v1496_v0  ;;  %vm202_vm6 = vcmp.le.s32.totalorder %v1606_v14, 0  ;;  %vm241_vm7 = vcmp.ge.s32.totalorder %v240_v25, 64  ;;  %vm242_vm8 = vcmp.lt.s32.totalorder %v240_v25, 96  ;;  %vm203_vm11 = vcmp.le.s32.totalorder %v1606_v14, 1  ;;  %v53_v60 = vld [vmem:[#allocation4 + $0x20] sm:$0xff]  ;;  %v54_v61 = vld [vmem:[#allocation4 + $0x28] sm:$0xff]  ;;  %p1469_p3 = scmp.lt.s32.totalorder %s1133_s30, %s1133_s30 }
  0x2c   :  { %1325 = vmatpush3.bf16.msk.msra.mxu0 %vm1561_vm3, %v1320_v10  ;;  %v1151_v16 = vsel %vm202_vm6, 1.0, %v1498_v1  ;;  %vm1611_vm9 = vmand %vm241_vm7, %vm242_vm8  ;;  %v1152_v42 = vsel %vm203_vm11, 1.0, %v1498_v1  ;;  %v55_v62 = vld [vmem:[#allocation4 + $0x30] sm:$0xff]  ;;  %v56_v63 = vld [vmem:[#allocation4 + $0x38] sm:$0xff]  ;;  %vm204_vm12 = vcmp.le.s32.totalorder %v1606_v14, 2  ;;  %vm205_vm13 = vcmp.le.s32.totalorder %v1606_v14, 3 }
  0x2d   :  { %1338 = vmatprep.subr.bf16.mxu0 %v1496_v0  ;;  %227 = vst.msk [vmem:[#allocation3] sm:$0xff] %vm226_vm5, %v1151_v16  ;;  %228 = vst.msk [vmem:[#allocation3 + $0x8] sm:$0xff] %vm226_vm5, %v1152_v42  ;;  %vm206_vm14 = vcmp.le.s32.totalorder %v1606_v14, 4  ;;  %vm207_vm15 = vcmp.le.s32.totalorder %v1606_v14, 5  ;;  %vm209_vm1 = vcmp.le.s32.totalorder %v1606_v14, 7 }
  0x2e   :  { %1331 = vmatpush3.bf16.msra.mxu1 %v1581_v12 }
  0x2f   :  { %1221 = vmatmul.mubr.msk.f32.vlgmr.msra.gmra.mrb[0].mxu0 %vm59_vm4, %v50_v13  ;;  %1332 = vmatprep.subr.bf16.mxu1 %v1496_v0 }
  0x30   :  { %1340 = vmatpush3.bf16.msra.mxu0 %v1571_v6  ;;  %1223 = vmatprep.mubr.msk.f32.mxu0 %vm59_vm4, %v51_v58 }
  0x31   :  { %1241 = vmatmul.mubr.f32.vlgmr.msra.gmra.mrb[0].mxu1 %v1498_v1  ;;  %1341 = vmatprep.subr.bf16.mxu0 %v1496_v0 }
  0x32   :  { %1334 = vmatpush3.bf16.msra.mxu1 %v1571_v6  ;;  %1251 = vmatprep.mubr.msk.f32.mxu1 %vm1497_vm0, %v1498_v1 }
  0x33   :  { %1335 = vmatprep.subr.bf16.mxu1 %v1496_v0  ;;  %1224 = vmatmul.mubr.msk.f32.gmra.mrb[2].mxu0 %vm59_vm4, %v52_v59 }
  0x34   :  { %1343 = vmatpush3.bf16.msra.mxu0 %v1581_v12  ;;  %v344_v17 = vld [vmem:[#allocation3] sm:$0xff]  ;;  %v453_v51 = vld [vmem:[#allocation3 + $0x8] sm:$0xff]  ;;  %1226 = vmatprep.mubr.msk.f32.mxu0 %vm59_vm4, %v53_v60 }
  0x35   :  { %1350 = vmatprep.subr.bf16.mxu0 %v1496_v0  ;;  %347 = vperm.xlu1 %1386, %v344_v17   ;;  %v1153_v17 = vsel %vm204_vm12, 1.0, %v1498_v1 }
  0x36   :  { %1337 = vmatpush3.bf16.msra.mxu1 %v1581_v12  ;;  %229 = vst.msk [vmem:[#allocation3 + $0x10] sm:$0xff] %vm226_vm5, %v1153_v17 }
  0x37   :  { %1344 = vmatprep.subr.bf16.mxu1 %v1496_v0  ;;  %1227 = vmatmul.mubr.msk.f32.gmra.mrb[4].mxu0 %vm59_vm4, %v54_v61 }
  0x38   :  { %1229 = vmatprep.mubr.msk.f32.mxu0 %vm59_vm4, %v55_v62  ;;  %v1155_v62 = vsel %vm206_vm14, 1.0, %v1498_v1 }
  0x39   :  { %231 = vst.msk [vmem:[#allocation3 + $0x20] sm:$0xff] %vm226_vm5, %v1155_v62 }
  0x3b   :  { %1230 = vmatmul.mubr.msk.f32.gmra.mrb[6].mxu0 %vm59_vm4, %v56_v63 }
  0x3c   :  { %1262 = vmatprep.mubr.msk.f32.mxu0 %vm1497_vm0, %v1498_v1 }
  0xb4   :  { %v348_v37 = vpop.permute.xlu1 %347 }
 0x102   :  { %v1222_v18 = vpop.f32.mrb[0].mxu0 }
 0x103   :  { %v154_v19 = vpop.f32.mrb[1].mxu0 }
 0x104   :  { %v315_v20 = vpop.f32.mrb[0].mxu1 }
 0x105   :  { %v319_v21 = vadd.f32 %v315_v20, %v154_v19  ;;  %v1242_v22 = vpop.f32.mrb[1].mxu1 }
 0x106   :  { %v1225_v8 = vpop.f32.mrb[2].mxu0 }
 0x107   :  { %v320_v23 = vmul.f32 0.5, %v319_v21  ;;  %v164_v9 = vpop.f32.mrb[3].mxu0 }
 0x109   :  { %1388 = vtanh.f32 %v320_v23 }
 0x10a   :  { %v1645_v10 = vpop.f32.mrb[4].mxu0 }
 0x10b   :  { %v1647_v11 = vpop.f32.mrb[5].mxu0 }
 0x10e   :  { %v1649_v13 = vpop.f32.mrb[6].mxu0 }
 0x10f   :  { %v1651_v15 = vpop.f32.mrb[7].mxu0 }
 0x113   :  { %v1389_v26 = vpop.eup %1388 }
 0x114   :  { %v322_v27 = vmul.f32 0.5, %v1389_v26 }
 0x116   :  { %v323_v29 = vadd.f32 0.5, %v322_v27 }
 0x118   :  { %v326_v30 = vsel %vm1611_vm9, %v1389_v26, %v323_v29  ;;  %v562_v26 = vld [vmem:[#allocation3 + $0x10] sm:$0xff] }
 0x119   :  { %329 = vrot.lane.b32.xlu0 %v326_v30, %s1501_s1  ;;  %v327_v33 = vmul.f32 0.0, %v326_v30 }
 0x18b   :  { %v330_v31 = vpop.permute.xlu0 %329 }
 0x18c   :  { %v332_v32 = vmul.f32 %v330_v31, %v326_v30 }
 0x18e   :  { %334 = vrot.lane.b32.xlu0 %v332_v32, %s1502_s26 }
 0x200   :  { %v335_v34 = vpop.permute.xlu0 %334 }
 0x201   :  { %v337_v35 = vadd.f32 %v335_v34, %v327_v33 }
 0x203   :  { %1390 = vtanh.f32 %v337_v35  ;;  %v351_v54 = vmul.f32 %v348_v37, %v337_v35 }
 0x20d   :  { %v1391_v36 = vpop.eup %1390 }
 0x20e   :  { %340 = vrot.lane.b32.xlu1 %v1391_v36, %s1501_s1 }
 0x280   :  { %v341_v38 = vpop.permute.xlu1 %340 }
 0x281   :  { %v343_v39 = vmul.f32 %v341_v38, %v326_v30 }
 0x283   :  { %v350_v40 = vmul.f32 %v348_v37, %v343_v39 }
 0x285   :  { %355 = vrot.lane.b32.xlu0 %v350_v40, %s1502_s26  ;;  %v1154_v40 = vsel %vm205_vm13, 1.0, %v1498_v1 }
 0x286   :  { %230 = vst.msk [vmem:[#allocation3 + $0x18] sm:$0xff] %vm226_vm5, %v1154_v40 }
 0x2f7   :  { %v356_v41 = vpop.permute.xlu0 %355 }
 0x2f8   :  { %1252 = vmatmul.mubr.msk.f32.vlgmr.msra.gmra.mrb[2].mxu1 %vm245_vm10, %v356_v41 }
 0x2f9   :  { %1346 = vmatpush3.bf16.msra.mxu1 %v1571_v6  ;;  %1273 = vmatprep.mubr.msk.f32.mxu1 %vm1497_vm0, %v1498_v1 }
 0x2fa   :  { %1347 = vmatprep.subr.bf16.mxu1 %v1496_v0 }
 0x2fd   :  { %1349 = vmatpush3.bf16.msra.mxu1 %v1581_v12 }
 0x2fe   :  { %1356 = vmatprep.subr.bf16.mxu1 %v1496_v0 }
 0x3cb   :  { %v425_v43 = vpop.f32.mrb[2].mxu1 }
 0x3cc   :  { %v429_v44 = vadd.f32 %v1222_v18, %v425_v43  ;;  %v1253_v45 = vpop.f32.mrb[3].mxu1 }
 0x3ce   :  { %v430_v46 = vmul.f32 0.5, %v429_v44 }
 0x3d0   :  { %1392 = vtanh.f32 %v430_v46 }
 0x3da   :  { %v1393_v47 = vpop.eup %1392 }
 0x3db   :  { %v432_v48 = vmul.f32 0.5, %v1393_v47 }
 0x3dd   :  { %v433_v49 = vadd.f32 0.5, %v432_v48 }
 0x3df   :  { %v434_v50 = vsel %vm1611_vm9, %v1393_v47, %v433_v49  ;;  %v671_v49 = vld [vmem:[#allocation3 + $0x18] sm:$0xff] }
 0x3e0   :  { %437 = vrot.lane.b32.xlu1 %v434_v50, %s1501_s1  ;;  %v435_v55 = vmul.f32 %v434_v50, %v351_v54 }
 0x3e4   :  { %456 = vperm.xlu1 %1386, %v453_v51  }
 0x452   :  { %v438_v52 = vpop.permute.xlu1 %437 }
 0x453   :  { %v440_v53 = vmul.f32 %v438_v52, %v434_v50 }
 0x455   :  { %442 = vrot.lane.b32.xlu0 %v440_v53, %s1502_s26 }
 0x463   :  { %v457_v5 = vpop.permute.xlu1 %456 }
 0x4c7   :  { %v443_v56 = vpop.permute.xlu0 %442 }
 0x4c8   :  { %v445_v57 = vadd.f32 %v443_v56, %v435_v55 }
 0x4ca   :  { %1394 = vtanh.f32 %v445_v57  ;;  %v460_v30 = vmul.f32 %v457_v5, %v445_v57 }
 0x4d4   :  { %v1395_v2 = vpop.eup %1394 }
 0x4d5   :  { %448 = vrot.lane.b32.xlu0 %v1395_v2, %s1501_s1 }
 0x547   :  { %v449_v3 = vpop.permute.xlu0 %448 }
 0x548   :  { %v451_v4 = vmul.f32 %v449_v3, %v434_v50 }
 0x54a   :  { %v459_v7 = vmul.f32 %v457_v5, %v451_v4 }
 0x54c   :  { %464 = vrot.lane.b32.xlu1 %v459_v7, %s1502_s26 }
 0x5be   :  { %v465_v16 = vpop.permute.xlu1 %464 }
 0x5bf   :  { %1263 = vmatmul.mubr.msk.f32.vlgmr.msra.gmra.mrb[8].mxu0 %vm245_vm10, %v465_v16  ;;  %v780_v16 = vld [vmem:[#allocation3 + $0x20] sm:$0xff] }
 0x5c0   :  { %1352 = vmatpush3.bf16.msra.mxu0 %v1571_v6  ;;  %1284 = vmatprep.mubr.msk.f32.mxu0 %vm1497_vm0, %v1498_v1 }
 0x5c1   :  { %1353 = vmatprep.subr.bf16.mxu0 %v1496_v0 }
 0x5c4   :  { %1355 = vmatpush3.bf16.msra.mxu0 %v1581_v12 }
 0x5c5   :  { %1362 = vmatprep.subr.bf16.mxu0 %v1496_v0 }
 0x692   :  { %v534_v18 = vpop.f32.mrb[8].mxu0 }
 0x693   :  { %v538_v19 = vadd.f32 %v534_v18, %v164_v9  ;;  %v1264_v20 = vpop.f32.mrb[9].mxu0 }
 0x695   :  { %v539_v21 = vmul.f32 0.5, %v538_v19 }
 0x697   :  { %1396 = vtanh.f32 %v539_v21 }
 0x6a1   :  { %v1397_v22 = vpop.eup %1396 }
 0x6a2   :  { %v541_v23 = vmul.f32 0.5, %v1397_v22 }
 0x6a4   :  { %v542_v24 = vadd.f32 0.5, %v541_v23 }
 0x6a6   :  { %v543_v25 = vsel %vm1611_vm9, %v1397_v22, %v542_v24 }
 0x6a7   :  { %546 = vrot.lane.b32.xlu0 %v543_v25, %s1501_s1  ;;  %v544_v31 = vmul.f32 %v543_v25, %v460_v30 }
 0x6ab   :  { %565 = vperm.xlu0 %1387, %v562_v26  }
 0x719   :  { %v547_v27 = vpop.permute.xlu0 %546 }
 0x71a   :  { %v549_v29 = vmul.f32 %v547_v27, %v543_v25 }
 0x71c   :  { %551 = vrot.lane.b32.xlu1 %v549_v29, %s1502_s26  ;;  %v1156_v29 = vsel %vm207_vm15, 1.0, %v1498_v1 }
 0x71d   :  { %232 = vst.msk [vmem:[#allocation3 + $0x28] sm:$0xff] %vm226_vm5, %v1156_v29 }
 0x72a   :  { %v566_v37 = vpop.permute.xlu0 %565 }
 0x78e   :  { %v552_v32 = vpop.permute.xlu1 %551 }
 0x78f   :  { %v554_v33 = vadd.f32 %v552_v32, %v544_v31 }
 0x791   :  { %1398 = vtanh.f32 %v554_v33  ;;  %v569_v52 = vmul.f32 %v566_v37, %v554_v33 }
 0x79b   :  { %v1399_v34 = vpop.eup %1398 }
 0x79c   :  { %557 = vrot.lane.b32.xlu1 %v1399_v34, %s1501_s1 }
 0x80e   :  { %v558_v35 = vpop.permute.xlu1 %557 }
 0x80f   :  { %v560_v36 = vmul.f32 %v558_v35, %v543_v25 }
 0x811   :  { %v568_v38 = vmul.f32 %v566_v37, %v560_v36 }
 0x813   :  { %573 = vrot.lane.b32.xlu1 %v568_v38, %s1502_s26 }
 0x885   :  { %v574_v39 = vpop.permute.xlu1 %573 }
 0x886   :  { %1274 = vmatmul.mubr.msk.f32.vlgmr.msra.gmra.mrb[4].mxu1 %vm245_vm10, %v574_v39 }
 0x887   :  { %1358 = vmatpush3.bf16.msra.mxu1 %v1571_v6  ;;  %1295 = vmatprep.mubr.msk.f32.mxu1 %vm1497_vm0, %v1498_v1 }
 0x888   :  { %1359 = vmatprep.subr.bf16.mxu1 %v1496_v0 }
 0x88b   :  { %1361 = vmatpush3.bf16.msra.mxu1 %v1581_v12 }
 0x88c   :  { %1368 = vmatprep.subr.bf16.mxu1 %v1496_v0 }
 0x959   :  { %v643_v41 = vpop.f32.mrb[4].mxu1 }
 0x95a   :  { %v647_v42 = vadd.f32 %v1225_v8, %v643_v41  ;;  %v1275_v43 = vpop.f32.mrb[5].mxu1 }
 0x95c   :  { %v648_v44 = vmul.f32 0.5, %v647_v42 }
 0x95e   :  { %1400 = vtanh.f32 %v648_v44 }
 0x968   :  { %v1401_v45 = vpop.eup %1400 }
 0x969   :  { %v650_v46 = vmul.f32 0.5, %v1401_v45 }
 0x96b   :  { %v651_v47 = vadd.f32 0.5, %v650_v46 }
 0x96d   :  { %v652_v48 = vsel %vm1611_vm9, %v1401_v45, %v651_v47 }
 0x96e   :  { %655 = vrot.lane.b32.xlu0 %v652_v48, %s1501_s1  ;;  %v653_v53 = vmul.f32 %v652_v48, %v569_v52 }
 0x972   :  { %674 = vperm.xlu0 %1387, %v671_v49  }
 0x9e0   :  { %v656_v50 = vpop.permute.xlu0 %655 }
 0x9e1   :  { %v658_v51 = vmul.f32 %v656_v50, %v652_v48 }
 0x9e3   :  { %660 = vrot.lane.b32.xlu1 %v658_v51, %s1502_s26 }
 0x9f1   :  { %v675_v59 = vpop.permute.xlu0 %674 }
 0xa55   :  { %v661_v54 = vpop.permute.xlu1 %660 }
 0xa56   :  { %v663_v55 = vadd.f32 %v661_v54, %v653_v53 }
 0xa58   :  { %1402 = vtanh.f32 %v663_v55  ;;  %v678_v19 = vmul.f32 %v675_v59, %v663_v55 }
 0xa62   :  { %v1403_v56 = vpop.eup %1402 }
 0xa63   :  { %666 = vrot.lane.b32.xlu1 %v1403_v56, %s1501_s1 }
 0xad5   :  { %v667_v57 = vpop.permute.xlu1 %666 }
 0xad6   :  { %v669_v58 = vmul.f32 %v667_v57, %v652_v48 }
 0xad8   :  { %v677_v60 = vmul.f32 %v675_v59, %v669_v58 }
 0xada   :  { %682 = vrot.lane.b32.xlu0 %v677_v60, %s1502_s26 }
 0xb4c   :  { %v683_v61 = vpop.permute.xlu0 %682 }
 0xb4d   :  { %1285 = vmatmul.mubr.msk.f32.vlgmr.msra.gmra.mrb[10].mxu0 %vm245_vm10, %v683_v61 }
 0xb4e   :  { %1364 = vmatpush3.bf16.msra.mxu0 %v1571_v6  ;;  %1306 = vmatprep.mubr.msk.f32.mxu0 %vm1497_vm0, %v1498_v1 }
 0xb4f   :  { %1365 = vmatprep.subr.bf16.mxu0 %v1496_v0 }
 0xb52   :  { %1367 = vmatpush3.bf16.msra.mxu0 %v1581_v12 }
 0xc20   :  { %v752_v63 = vpop.f32.mrb[10].mxu0 }
 0xc21   :  { %v756_v2 = vadd.f32 %v752_v63, %v1647_v11  ;;  %v1286_v3 = vpop.f32.mrb[11].mxu0 }
 0xc23   :  { %v757_v4 = vmul.f32 0.5, %v756_v2 }
 0xc25   :  { %1404 = vtanh.f32 %v757_v4 }
 0xc2f   :  { %v1405_v5 = vpop.eup %1404 }
 0xc30   :  { %v759_v7 = vmul.f32 0.5, %v1405_v5 }
 0xc32   :  { %v760_v8 = vadd.f32 0.5, %v759_v7  ;;  %v1158_v7 = vsel %vm209_vm1, 1.0, %v1498_v1 }
 0xc33   :  { %234 = vst.msk [vmem:[#allocation3 + $0x38] sm:$0xff] %vm226_vm5, %v1158_v7 }
 0xc34   :  { %v761_v9 = vsel %vm1611_vm9, %v1405_v5, %v760_v8 }
 0xc35   :  { %764 = vrot.lane.b32.xlu1 %v761_v9, %s1501_s1  ;;  %v762_v20 = vmul.f32 %v761_v9, %v678_v19 }
 0xc39   :  { %783 = vperm.xlu1 %1386, %v780_v16  }
 0xca7   :  { %v765_v17 = vpop.permute.xlu1 %764 }
 0xca8   :  { %v767_v18 = vmul.f32 %v765_v17, %v761_v9 }
 0xcaa   :  { %769 = vrot.lane.b32.xlu0 %v767_v18, %s1502_s26 }
 0xcb8   :  { %v784_v25 = vpop.permute.xlu1 %783 }
 0xd1c   :  { %v770_v11 = vpop.permute.xlu0 %769 }
 0xd1d   :  { %v772_v21 = vadd.f32 %v770_v11, %v762_v20 }
 0xd1f   :  { %1406 = vtanh.f32 %v772_v21  ;;  %v787_v38 = vmul.f32 %v784_v25, %v772_v21  ;;  %v1107_v21 = vld [vmem:[#allocation3 + $0x38] sm:$0xff] }
 0xd29   :  { %v1407_v22 = vpop.eup %1406 }
 0xd2a   :  { %775 = vrot.lane.b32.xlu0 %v1407_v22, %s1501_s1 }
 0xd9c   :  { %v776_v23 = vpop.permute.xlu0 %775 }
 0xd9d   :  { %v778_v24 = vmul.f32 %v776_v23, %v761_v9 }
 0xd9f   :  { %v786_v26 = vmul.f32 %v784_v25, %v778_v24 }
 0xda1   :  { %791 = vrot.lane.b32.xlu1 %v786_v26, %s1502_s26 }
 0xe13   :  { %v792_v27 = vpop.permute.xlu1 %791 }
 0xe14   :  { %1296 = vmatmul.mubr.msk.f32.vlgmr.msra.gmra.mrb[6].mxu1 %vm245_vm10, %v792_v27 }
 0xe15   :  { %1370 = vmatpush3.bf16.msra.mxu1 %v1571_v6  ;;  %1317 = vmatprep.mubr.msk.f32.mxu1 %vm1497_vm0, %v1498_v1  ;;  %vm208_vm0 = vcmp.le.s32.totalorder %v1606_v14, 6 }
 0xe16   :  { %1371 = vmatprep.subr.bf16.mxu1 %v1496_v0  ;;  %v1157_v47 = vsel %vm208_vm0, 1.0, %v1498_v1 }
 0xe17   :  { %233 = vst.msk [vmem:[#allocation3 + $0x30] sm:$0xff] %vm226_vm5, %v1157_v47 }
 0xe19   :  { %1373 = vmatpush3.bf16.msra.mxu1 %v1581_v12  ;;  %v889_v12 = vld [vmem:[#allocation3 + $0x28] sm:$0xff] }
 0xe1e   :  { %v998_v56 = vld [vmem:[#allocation3 + $0x30] sm:$0xff] }
 0xee7   :  { %v861_v30 = vpop.f32.mrb[6].mxu1 }
 0xee8   :  { %v865_v31 = vadd.f32 %v1645_v10, %v861_v30  ;;  %v1297_v32 = vpop.f32.mrb[7].mxu1 }
 0xeea   :  { %v866_v33 = vmul.f32 0.5, %v865_v31 }
 0xeec   :  { %1408 = vtanh.f32 %v866_v33 }
 0xef6   :  { %v1409_v6 = vpop.eup %1408 }
 0xef7   :  { %v868_v34 = vmul.f32 0.5, %v1409_v6 }
 0xef9   :  { %v869_v35 = vadd.f32 0.5, %v868_v34 }
 0xefb   :  { %v870_v0 = vsel %vm1611_vm9, %v1409_v6, %v869_v35 }
 0xefc   :  { %873 = vrot.lane.b32.xlu0 %v870_v0, %s1501_s1  ;;  %v871_v39 = vmul.f32 %v870_v0, %v787_v38 }
 0xf00   :  { %892 = vperm.xlu0 %1387, %v889_v12  }
 0xf6e   :  { %v874_v36 = vpop.permute.xlu0 %873 }
 0xf6f   :  { %v876_v37 = vmul.f32 %v874_v36, %v870_v0 }
 0xf71   :  { %878 = vrot.lane.b32.xlu1 %v876_v37, %s1502_s26 }
 0xf7f   :  { %v893_v44 = vpop.permute.xlu0 %892 }
 0xfe3   :  { %v879_v10 = vpop.permute.xlu1 %878 }
 0xfe4   :  { %v881_v40 = vadd.f32 %v879_v10, %v871_v39 }
 0xfe6   :  { %1410 = vtanh.f32 %v881_v40  ;;  %v896_v59 = vmul.f32 %v893_v44, %v881_v40 }
 0xff0   :  { %v1411_v41 = vpop.eup %1410 }
 0xff1   :  { %884 = vrot.lane.b32.xlu1 %v1411_v41, %s1501_s1 }
0x1063   :  { %v885_v42 = vpop.permute.xlu1 %884 }
0x1064   :  { %v887_v43 = vmul.f32 %v885_v42, %v870_v0 }
0x1066   :  { %v895_v45 = vmul.f32 %v893_v44, %v887_v43 }
0x1068   :  { %900 = vrot.lane.b32.xlu0 %v895_v45, %s1502_s26 }
0x10da   :  { %v901_v46 = vpop.permute.xlu0 %900 }
0x10db   :  { %1307 = vmatmul.mubr.msk.f32.vlgmr.msra.gmra.mrb[12].mxu0 %vm245_vm10, %v901_v46 }
0x11ae   :  { %v970_v48 = vpop.f32.mrb[12].mxu0 }
0x11af   :  { %v974_v49 = vadd.f32 %v970_v48, %v1651_v15  ;;  %v1308_v50 = vpop.f32.mrb[13].mxu0 }
0x11b1   :  { %v975_v51 = vmul.f32 0.5, %v974_v49 }
0x11b3   :  { %1412 = vtanh.f32 %v975_v51 }
0x11bd   :  { %v1413_v52 = vpop.eup %1412 }
0x11be   :  { %v977_v53 = vmul.f32 0.5, %v1413_v52 }
0x11c0   :  { %v978_v54 = vadd.f32 0.5, %v977_v53 }
0x11c2   :  { %v979_v55 = vsel %vm1611_vm9, %v1413_v52, %v978_v54 }
0x11c3   :  { %982 = vrot.lane.b32.xlu1 %v979_v55, %s1501_s1  ;;  %v980_v60 = vmul.f32 %v979_v55, %v896_v59 }
0x11c7   :  { %1001 = vperm.xlu1 %1386, %v998_v56  }
0x1235   :  { %v983_v57 = vpop.permute.xlu1 %982 }
0x1236   :  { %v985_v58 = vmul.f32 %v983_v57, %v979_v55 }
0x1238   :  { %987 = vrot.lane.b32.xlu0 %v985_v58, %s1502_s26 }
0x1246   :  { %v1002_v3 = vpop.permute.xlu1 %1001 }
0x12aa   :  { %v988_v15 = vpop.permute.xlu0 %987 }
0x12ab   :  { %v990_v61 = vadd.f32 %v988_v15, %v980_v60 }
0x12ad   :  { %1414 = vtanh.f32 %v990_v61  ;;  %v1005_v22 = vmul.f32 %v1002_v3, %v990_v61 }
0x12b7   :  { %v1415_v62 = vpop.eup %1414 }
0x12b8   :  { %993 = vrot.lane.b32.xlu0 %v1415_v62, %s1501_s1 }
0x132a   :  { %v994_v63 = vpop.permute.xlu0 %993 }
0x132b   :  { %v996_v2 = vmul.f32 %v994_v63, %v979_v55 }
0x132d   :  { %v1004_v4 = vmul.f32 %v1002_v3, %v996_v2 }
0x132f   :  { %1009 = vrot.lane.b32.xlu1 %v1004_v4, %s1502_s26 }
0x13a1   :  { %v1010_v5 = vpop.permute.xlu1 %1009 }
0x13a2   :  { %1318 = vmatmul.mubr.msk.f32.vlgmr.msra.gmra.mrb[8].mxu1 %vm245_vm10, %v1010_v5 }
0x1475   :  { %v1079_v8 = vpop.f32.mrb[8].mxu1 }
0x1476   :  { %v1083_v9 = vadd.f32 %v1649_v13, %v1079_v8  ;;  %v1319_v16 = vpop.f32.mrb[9].mxu1  ;;  %v1114_v13 = vld [vmem:[%s1757_s2] sm:$0xff]  ;;  %s1464_s2 = scalar_lea.vmem %s1133_s30, 128 }
0x1477   :  { %p1465_p2 = scmp.ne.s32.totalorder %s1133_s30, %s1464_s2  ;;  %p1470_p4 = scmp.lt.s32.totalorder %s1464_s2, %s1464_s2 }
0x1478   :  { %v1084_v17 = vmul.f32 0.5, %v1083_v9 }
0x1479   :  { %p1471_p5 = por %p1470_p4, %p1469_p3 }
0x147a   :  { %1416 = vtanh.f32 %v1084_v17 }
0x147b   :  { %p1472_p6 = pnand %p1471_p5, %p1465_p2 }
0x1484   :  { %v1417_v18 = vpop.eup %1416 }
0x1485   :  { %v1086_v19 = vmul.f32 0.5, %v1417_v18 }
0x1487   :  { %v1087_v20 = vadd.f32 0.5, %v1086_v19 }
0x1489   :  { %v1088_v11 = vsel %vm1611_vm9, %v1417_v18, %v1087_v20 }
0x148a   :  { %1091 = vrot.lane.b32.xlu0 %v1088_v11, %s1501_s1  ;;  %v1089_v23 = vmul.f32 %v1088_v11, %v1005_v22 }
0x148e   :  { %1110 = vperm.xlu0 %1387, %v1107_v21  }
0x14fc   :  { %v1092_v14 = vpop.permute.xlu0 %1091 }
0x14fd   :  { %v1094_v1 = vmul.f32 %v1092_v14, %v1088_v11 }
0x14ff   :  { %1096 = vrot.lane.b32.xlu1 %v1094_v1, %s1502_s26 }
0x1503   :  { %1117 = vperm.xlu1 %1386, %v1114_v13  }
0x150d   :  { %v1111_v26 = vpop.permute.xlu0 %1110 }
0x1571   :  { %v1097_v24 = vpop.permute.xlu1 %1096 }
0x1572   :  { %v1099_v25 = vadd.f32 %v1097_v24, %v1089_v23 }
0x1574   :  { %1418 = vtanh.f32 %v1099_v25 }
0x157e   :  { %v1419_v28 = vpop.eup %1418 }
0x157f   :  { %1102 = vrot.lane.b32.xlu0 %v1419_v28, %s1501_s1 }
0x1582   :  { %v1118_v31 = vpop.permute.xlu1 %1117 }
0x15f1   :  { %v1103_v27 = vpop.permute.xlu0 %1102 }
0x15f2   :  { %v1105_v29 = vmul.f32 %v1103_v27, %v1088_v11 }
0x15f4   :  { %v1113_v30 = vmul.f32 %v1111_v26, %v1105_v29 }
0x15f6   :  { %v1120_v32 = vmul.f32 %v1118_v31, %v1113_v30 }
0x15f8   :  { %1122 = vrot.lane.b32.xlu1 %v1120_v32, %s1502_s26 }
0x166a   :  { %v1123_v33 = vpop.permute.xlu1 %1122 }
0x166b   :  { %1125 = vst.msk [vmem:[#allocation9] sm:$0xff] %vm245_vm10, %v1123_v33 }
0x166c   :  { %1475 = shalt.err (!%p1472_p6)
}
0x166d   :  { %s1476_s8 = scalar_lea.hbm %s1760_s5, 128 }
0x166e   :  { %p1477_p7 = scmp.ne.s32.totalorder %s1760_s5, %s1476_s8  ;;  %p1480_p8 = scmp.lt.u32.totalorder %s1476_s8, %s1760_s5 }
0x1670   :  { %p1482_p9 = pnand %p1480_p8, %p1477_p7 }
0x1672   :  { %1485 = shalt.err (!%p1482_p9)
}
0x1673   :  { %1135 = dma.vmem_to_hbm [thread:$0]  %s1133_s30, 128, %s1760_s5, [#allocation6]  }
0x1674   :  { %1490 = dma.done.wait [#allocation6], 128  }
0x1675   :  { %1491 = vsyncadd [#allocation6], 4294967168 }
0x1676   :  { %1139 = vsyncpa [#allocation5], 1 }
0x1677   :  { %1140 = vsyncpa [#allocation8], 1 }
0x1678   :  { %1141 = vsyncpa [#allocation6], 1 }

</bundles_post_ra>
